<compile_context>
chip_gen: v6e
topology: v6e:2x2x1
jax: 0.10.0
libtpu: 0.0.40
codegen_flags: <defaults>
</compile_context>

<pallas_src>
import math
import functools

import jax
import jax.numpy as jnp
from jax.experimental import pallas as pl
from jax.experimental.pallas import tpu as pltpu

# ArcFace hyper-parameters (match the PyTorch module defaults s=30, m=0.5).
_S = 30.0
_M = 0.5
_COS_M = math.cos(_M)
_SIN_M = math.sin(_M)
_TH = math.cos(math.pi - _M)
_MM = math.sin(math.pi - _M) * _M

_NEG_MASK = -1e30   # excludes the target column from the streamed LSE
_NEG_PAD = -1e4     # class-axis padding value (scaled exp underflows to 0)


def _round_up(x, m):
    return ((x + m - 1) // m) * m


def _arcface_kernel(logits_ref, labels_ref, out_ref, m_acc, l_acc, t_acc):
    c = pl.program_id(1)
    nc = pl.num_programs(1)

    @pl.when(c == 0)
    def _init():
        m_acc[...] = jnp.full_like(m_acc, -jnp.inf)
        l_acc[...] = jnp.zeros_like(l_acc)
        t_acc[...] = jnp.zeros_like(t_acc)

    # Stream the tile in its stored dtype; do all math in f32 (v5e has no
    # bf16 VPU/EUP, and it is numerically required for the exp/log path).
    cosine = logits_ref[...].astype(jnp.float32)          # (bt, ct)
    labels = labels_ref[...]                              # (bt, 1) int32

    c_tile = cosine.shape[1]
    class_ids = c * c_tile + jax.lax.broadcasted_iota(jnp.int32, cosine.shape, 1)
    is_target = class_ids == labels                       # (bt, ct) bool

    # Accumulate the target-column cosine; margin math is deferred to finalize
    # so no full-tile sqrt / where / blend is ever materialized.
    t_acc[...] += jnp.sum(jnp.where(is_target, cosine, 0.0), axis=-1, keepdims=True)

    # Online logsumexp over the *non-target* scaled logits of this tile.
    scores = jnp.where(is_target, _NEG_MASK, _S * cosine)
    m_prev = m_acc[...]
    m_new = jnp.maximum(m_prev, jnp.max(scores, axis=-1, keepdims=True))
    l_acc[...] = (l_acc[...] * jnp.exp(m_prev - m_new)
                  + jnp.sum(jnp.exp(scores - m_new), axis=-1, keepdims=True))
    m_acc[...] = m_new

    @pl.when(c == nc - 1)
    def _finalize():
        cos_t = t_acc[...]                                 # (bt, 1)
        sin_t = jnp.sqrt(jnp.maximum(1.0 - cos_t * cos_t, 0.0))
        phi = cos_t * _COS_M - sin_t * _SIN_M
        phi = jnp.where(cos_t > _TH, phi, cos_t - _MM)
        tgt = _S * phi                                     # modified target logit
        # Fold the target logit back into the logsumexp.
        m_fin = jnp.maximum(m_acc[...], tgt)
        l_fin = l_acc[...] * jnp.exp(m_acc[...] - m_fin) + jnp.exp(tgt - m_fin)
        # per-row cross entropy: LSE(output) - output[target]
        out_ref[...] = (m_fin + jnp.log(l_fin)) - tgt


@functools.partial(jax.jit, static_argnames=("b_tile", "c_tile"))
def arcface_loss(logits, labels, *, b_tile=256, c_tile=2048):
    """logits: (B, C) float array (cosines); labels: (B,) int class indices."""
    B, C = logits.shape

    # Tile sizing: lane-dense class tiles (multiple of 128), sublane-aligned
    # batch tiles (8 for f32, 16 for bf16).  Double-buffered input blocks stay
    # a few MiB, safe for v5e/v6e (128 MiB VMEM) and v7x (64 MiB).
    sub = 16 if logits.dtype == jnp.bfloat16 else 8
    b_tile = _round_up(max(sub, min(b_tile, _round_up(B, sub))), sub)
    c_tile = _round_up(max(128, min(c_tile, _round_up(C, 128))), 128)
    B_pad = _round_up(B, b_tile)
    C_pad = _round_up(C, c_tile)

    # Pad: class padding very negative (its scaled exp underflows to 0), batch
    # padding produces finite per-row garbage that is sliced off below.
    logits_p = jnp.pad(logits, ((0, B_pad - B), (0, C_pad - C)),
                       constant_values=_NEG_PAD)
    labels_p = jnp.pad(labels.astype(jnp.int32), (0, B_pad - B)).reshape(B_pad, 1)

    per_row = pl.pallas_call(
        _arcface_kernel,
        out_shape=jax.ShapeDtypeStruct((B_pad, 1), jnp.float32),
        grid=(B_pad // b_tile, C_pad // c_tile),
        in_specs=[
            pl.BlockSpec((b_tile, c_tile), lambda b, c: (b, c)),  # logits stream
            pl.BlockSpec((b_tile, 1), lambda b, c: (b, 0)),       # labels (resident)
        ],
        out_specs=pl.BlockSpec((b_tile, 1), lambda b, c: (b, 0)), # per-row loss
        scratch_shapes=[
            pltpu.VMEM((b_tile, 1), jnp.float32),   # running max
            pltpu.VMEM((b_tile, 1), jnp.float32),   # running sum-exp
            pltpu.VMEM((b_tile, 1), jnp.float32),   # target cosine
        ],
        compiler_params=pltpu.CompilerParams(
            dimension_semantics=("parallel", "arbitrary")),
    )(logits_p, labels_p)

    # Mean over the true (global) batch size only.
    return jnp.mean(per_row[:B, 0])


def arcface_loss_ref(logits, labels):
    """Pure-JAX reference mirroring the PyTorch module."""
    logits = logits.astype(jnp.float32)
    onehot = jax.nn.one_hot(labels, logits.shape[1], dtype=jnp.float32)
    cosine = logits
    sine = jnp.sqrt(jnp.maximum(1.0 - cosine ** 2, 0.0))
    phi = cosine * _COS_M - sine * _SIN_M
    phi = jnp.where(cosine > _TH, phi, cosine - _MM)
    output = (onehot * phi + (1.0 - onehot) * cosine) * _S
    logprobs = jax.nn.log_softmax(output, axis=-1)
    return jnp.mean(jnp.sum(-logprobs * onehot, axis=-1))


if __name__ == "__main__":
    key = jax.random.PRNGKey(0)
    k1, k2, k3, k4 = jax.random.split(key, 4)

    # Case 1: tiny single-tile problem (matches the module's toy shapes).
    B, C = 8, 16
    logits = jax.random.uniform(k1, (B, C), jnp.float32, minval=-1.0, maxval=1.0)
    labels = jax.random.randint(k2, (B,), 0, C, dtype=jnp.int32)
    loss = arcface_loss(logits, labels)
    jax.block_until_ready(loss)
    ref = arcface_loss_ref(logits, labels)
    assert jnp.allclose(loss, ref, rtol=1e-5, atol=1e-5), (loss, ref)

    # Case 2: exercises batch/class tiling, padding and the online LSE.
    B2, C2 = 20, 300
    logits2 = jax.random.uniform(k3, (B2, C2), jnp.float32, minval=-1.0, maxval=1.0)
    labels2 = jax.random.randint(k4, (B2,), 0, C2, dtype=jnp.int32)
    loss2 = arcface_loss(logits2, labels2, b_tile=8, c_tile=128)
    jax.block_until_ready(loss2)
    ref2 = arcface_loss_ref(logits2, labels2)
    assert jnp.allclose(loss2, ref2, rtol=1e-5, atol=1e-5), (loss2, ref2)

    # Case 3: bf16 over HBM, f32 compute inside the kernel.
    logits3 = logits2.astype(jnp.bfloat16)
    loss3 = arcface_loss(logits3, labels2, b_tile=16, c_tile=128)
    jax.block_until_ready(loss3)
    ref3 = arcface_loss_ref(logits3.astype(jnp.float32), labels2)
    assert jnp.allclose(loss3, ref3, rtol=1e-3, atol=1e-3), (loss3, ref3)

    print("KERNEL_OK")
</pallas_src>

<mosaic_0001>
module attributes {stable_mosaic.version = 11 : i64} {
  func.func @_arcface_kernel(%arg0: i32, %arg1: i32, %arg2: memref<8x128xf32, #tpu.memory_space<vmem>>, %arg3: memref<8x1xi32, #tpu.memory_space<vmem>>, %arg4: memref<8x1xf32, #tpu.memory_space<vmem>>, %arg5: memref<8x1xf32, #tpu.memory_space<vmem>>, %arg6: memref<8x1xf32, #tpu.memory_space<vmem>>, %arg7: memref<8x1xf32, #tpu.memory_space<vmem>>) attributes {dimension_semantics = [#tpu.dimension_semantics<parallel>, #tpu.dimension_semantics<arbitrary>], iteration_bounds = array<i64: 1, 1>, scalar_prefetch = 0 : i64, scratch_operands = 3 : i64, tpu.core_type = #tpu.core_type<tc>, window_params = [{transform_indices = @transform_0, window_bounds = array<i64: 8, 128>}, {transform_indices = @transform_1, window_bounds = array<i64: 8, 1>}, {transform_indices = @transform_2, window_bounds = array<i64: 8, 1>}]} {
    %c0_i32 = arith.constant 0 : i32
    %0 = arith.cmpi eq, %arg1, %c0_i32 : i32
    %1 = arith.extui %0 : i1 to i32
    %c0_i32_0 = arith.constant 0 : i32
    %2 = arith.cmpi ne, %1, %c0_i32_0 : i32
    scf.if %2 {
      %cst_23 = arith.constant 0xFF800000 : f32
      %41 = vector.broadcast %cst_23 : f32 to vector<8x1xf32>
      %c0_24 = arith.constant 0 : index
      %c0_25 = arith.constant 0 : index
      %42 = vector.load %arg5[%c0_24, %c0_25] : memref<8x1xf32, #tpu.memory_space<vmem>>, vector<8x1xf32>
      tpu.vector_store %arg5[%c0_24, %c0_25], %41 {strides = array<i32>} : memref<8x1xf32, #tpu.memory_space<vmem>>, vector<8x1xf32>,
      %cst_26 = arith.constant 0.000000e+00 : f32
      %43 = vector.broadcast %cst_26 : f32 to vector<8x1xf32>
      %c0_27 = arith.constant 0 : index
      %c0_28 = arith.constant 0 : index
      %44 = vector.load %arg6[%c0_27, %c0_28] : memref<8x1xf32, #tpu.memory_space<vmem>>, vector<8x1xf32>
      tpu.vector_store %arg6[%c0_27, %c0_28], %43 {strides = array<i32>} : memref<8x1xf32, #tpu.memory_space<vmem>>, vector<8x1xf32>,
      %cst_29 = arith.constant 0.000000e+00 : f32
      %45 = vector.broadcast %cst_29 : f32 to vector<8x1xf32>
      %c0_30 = arith.constant 0 : index
      %c0_31 = arith.constant 0 : index
      %46 = vector.load %arg7[%c0_30, %c0_31] : memref<8x1xf32, #tpu.memory_space<vmem>>, vector<8x1xf32>
      tpu.vector_store %arg7[%c0_30, %c0_31], %45 {strides = array<i32>} : memref<8x1xf32, #tpu.memory_space<vmem>>, vector<8x1xf32>,
    } else {
    }
    %c0 = arith.constant 0 : index
    %c0_1 = arith.constant 0 : index
    %3 = vector.load %arg2[%c0, %c0_1] : memref<8x128xf32, #tpu.memory_space<vmem>>, vector<8x128xf32>
    %c0_2 = arith.constant 0 : index
    %c0_3 = arith.constant 0 : index
    %4 = vector.load %arg3[%c0_2, %c0_3] : memref<8x1xi32, #tpu.memory_space<vmem>>, vector<8x1xi32>
    %c128_i32 = arith.constant 128 : i32
    %5 = arith.muli %arg1, %c128_i32 : i32
    %6 = tpu.iota {dimensions = array<i32: 1>} : vector<8x128xi32>
    %7 = vector.broadcast %5 : i32 to vector<8x128xi32>
    %8 = arith.addi %7, %6 : vector<8x128xi32>
    %9 = vector.broadcast %4 : vector<8x1xi32> to vector<8x128xi32>
    %10 = arith.cmpi eq, %8, %9 : vector<8x128xi32>
    %c0_4 = arith.constant 0 : index
    %c0_5 = arith.constant 0 : index
    %11 = vector.load %arg7[%c0_4, %c0_5] : memref<8x1xf32, #tpu.memory_space<vmem>>, vector<8x1xf32>
    %cst = arith.constant 0.000000e+00 : f32
    %12 = vector.broadcast %cst : f32 to vector<8x128xf32>
    %13 = arith.select %10, %3, %12 : vector<8x128xi1>, vector<8x128xf32>
    %cst_6 = arith.constant dense<0.000000e+00> : vector<8xf32>
    %14 = vector.multi_reduction <add>, %13, %cst_6 [1] : vector<8x128xf32> to vector<8xf32>
    %15 = vector.shape_cast %14 : vector<8xf32> to vector<8x1xf32>
    %16 = arith.addf %11, %15 : vector<8x1xf32>
    %c0_7 = arith.constant 0 : index
    %c0_8 = arith.constant 0 : index
    %17 = vector.load %arg7[%c0_7, %c0_8] : memref<8x1xf32, #tpu.memory_space<vmem>>, vector<8x1xf32>
    tpu.vector_store %arg7[%c0_7, %c0_8], %16 {strides = array<i32>} : memref<8x1xf32, #tpu.memory_space<vmem>>, vector<8x1xf32>,
    %cst_9 = arith.constant 3.000000e+01 : f32
    %18 = vector.broadcast %cst_9 : f32 to vector<8x128xf32>
    %19 = arith.mulf %18, %3 : vector<8x128xf32>
    %cst_10 = arith.constant -1.000000e+30 : f32
    %20 = vector.broadcast %cst_10 : f32 to vector<8x128xf32>
    %21 = arith.select %10, %20, %19 : vector<8x128xi1>, vector<8x128xf32>
    %c0_11 = arith.constant 0 : index
    %c0_12 = arith.constant 0 : index
    %22 = vector.load %arg5[%c0_11, %c0_12] : memref<8x1xf32, #tpu.memory_space<vmem>>, vector<8x1xf32>
    %cst_13 = arith.constant dense<0xFF800000> : vector<8xf32>
    %23 = vector.multi_reduction <maximumf>, %21, %cst_13 [1] : vector<8x128xf32> to vector<8xf32>
    %24 = vector.shape_cast %23 : vector<8xf32> to vector<8x1xf32>
    %25 = arith.maximumf %22, %24 : vector<8x1xf32>
    %c0_14 = arith.constant 0 : index
    %c0_15 = arith.constant 0 : index
    %26 = vector.load %arg6[%c0_14, %c0_15] : memref<8x1xf32, #tpu.memory_space<vmem>>, vector<8x1xf32>
    %27 = arith.subf %22, %25 : vector<8x1xf32>
    %28 = math.exp %27 : vector<8x1xf32>
    %29 = arith.mulf %26, %28 : vector<8x1xf32>
    %30 = vector.broadcast %25 : vector<8x1xf32> to vector<8x128xf32>
    %31 = arith.subf %21, %30 : vector<8x128xf32>
    %32 = math.exp %31 : vector<8x128xf32>
    %cst_16 = arith.constant dense<0.000000e+00> : vector<8xf32>
    %33 = vector.multi_reduction <add>, %32, %cst_16 [1] : vector<8x128xf32> to vector<8xf32>
    %34 = vector.shape_cast %33 : vector<8xf32> to vector<8x1xf32>
    %35 = arith.addf %29, %34 : vector<8x1xf32>
    %c0_17 = arith.constant 0 : index
    %c0_18 = arith.constant 0 : index
    %36 = vector.load %arg6[%c0_17, %c0_18] : memref<8x1xf32, #tpu.memory_space<vmem>>, vector<8x1xf32>
    tpu.vector_store %arg6[%c0_17, %c0_18], %35 {strides = array<i32>} : memref<8x1xf32, #tpu.memory_space<vmem>>, vector<8x1xf32>,
    %c0_19 = arith.constant 0 : index
    %c0_20 = arith.constant 0 : index
    %37 = vector.load %arg5[%c0_19, %c0_20] : memref<8x1xf32, #tpu.memory_space<vmem>>, vector<8x1xf32>
    tpu.vector_store %arg5[%c0_19, %c0_20], %25 {strides = array<i32>} : memref<8x1xf32, #tpu.memory_space<vmem>>, vector<8x1xf32>,
    %c0_i32_21 = arith.constant 0 : i32
    %38 = arith.cmpi eq, %arg1, %c0_i32_21 : i32
    %39 = arith.extui %38 : i1 to i32
    %c0_i32_22 = arith.constant 0 : i32
    %40 = arith.cmpi ne, %39, %c0_i32_22 : i32
    scf.if %40 {
      %c0_23 = arith.constant 0 : index
      %c0_24 = arith.constant 0 : index
      %41 = vector.load %arg7[%c0_23, %c0_24] : memref<8x1xf32, #tpu.memory_space<vmem>>, vector<8x1xf32>
      %42 = arith.mulf %41, %41 : vector<8x1xf32>
      %cst_25 = arith.constant 1.000000e+00 : f32
      %43 = vector.broadcast %cst_25 : f32 to vector<8x1xf32>
      %44 = arith.subf %43, %42 : vector<8x1xf32>
      %cst_26 = arith.constant 0.000000e+00 : f32
      %45 = vector.broadcast %cst_26 : f32 to vector<8x1xf32>
      %46 = arith.maximumf %44, %45 : vector<8x1xf32>
      %47 = math.sqrt %46 : vector<8x1xf32>
      %cst_27 = arith.constant 0.87758255 : f32
      %48 = vector.broadcast %cst_27 : f32 to vector<8x1xf32>
      %49 = arith.mulf %41, %48 : vector<8x1xf32>
      %cst_28 = arith.constant 0.47942555 : f32
      %50 = vector.broadcast %cst_28 : f32 to vector<8x1xf32>
      %51 = arith.mulf %47, %50 : vector<8x1xf32>
      %52 = arith.subf %49, %51 : vector<8x1xf32>
      %cst_29 = arith.constant -0.87758255 : f32
      %53 = vector.broadcast %cst_29 : f32 to vector<8x1xf32>
      %54 = arith.cmpf ogt, %41, %53 : vector<8x1xf32>
      %cst_30 = arith.constant 0.239712775 : f32
      %55 = vector.broadcast %cst_30 : f32 to vector<8x1xf32>
      %56 = arith.subf %41, %55 : vector<8x1xf32>
      %57 = arith.select %54, %52, %56 : vector<8x1xi1>, vector<8x1xf32>
      %cst_31 = arith.constant 3.000000e+01 : f32
      %58 = vector.broadcast %cst_31 : f32 to vector<8x1xf32>
      %59 = arith.mulf %58, %57 : vector<8x1xf32>
      %c0_32 = arith.constant 0 : index
      %c0_33 = arith.constant 0 : index
      %60 = vector.load %arg5[%c0_32, %c0_33] : memref<8x1xf32, #tpu.memory_space<vmem>>, vector<8x1xf32>
      %61 = arith.maximumf %60, %59 : vector<8x1xf32>
      %c0_34 = arith.constant 0 : index
      %c0_35 = arith.constant 0 : index
      %62 = vector.load %arg6[%c0_34, %c0_35] : memref<8x1xf32, #tpu.memory_space<vmem>>, vector<8x1xf32>
      %c0_36 = arith.constant 0 : index
      %c0_37 = arith.constant 0 : index
      %63 = vector.load %arg5[%c0_36, %c0_37] : memref<8x1xf32, #tpu.memory_space<vmem>>, vector<8x1xf32>
      %64 = arith.subf %63, %61 : vector<8x1xf32>
      %65 = math.exp %64 : vector<8x1xf32>
      %66 = arith.mulf %62, %65 : vector<8x1xf32>
      %67 = arith.subf %59, %61 : vector<8x1xf32>
      %68 = math.exp %67 : vector<8x1xf32>
      %69 = arith.addf %66, %68 : vector<8x1xf32>
      %70 = math.log %69 : vector<8x1xf32>
      %71 = arith.addf %61, %70 : vector<8x1xf32>
      %72 = arith.subf %71, %59 : vector<8x1xf32>
      %c0_38 = arith.constant 0 : index
      %c0_39 = arith.constant 0 : index
      %73 = vector.load %arg4[%c0_38, %c0_39] : memref<8x1xf32, #tpu.memory_space<vmem>>, vector<8x1xf32>
      tpu.vector_store %arg4[%c0_38, %c0_39], %72 {strides = array<i32>} : memref<8x1xf32, #tpu.memory_space<vmem>>, vector<8x1xf32>,
    } else {
    }
    return
  }
  func.func @transform_0(%arg0: i32, %arg1: i32) -> (i32, i32) {
    %c0_i32 = arith.constant 0 : i32
    return %arg0, %arg1 : i32, i32
  }
  func.func @transform_1(%arg0: i32, %arg1: i32) -> (i32, i32) {
    %c0_i32 = arith.constant 0 : i32
    %c0_i32_0 = arith.constant 0 : i32
    return %arg0, %c0_i32 : i32, i32
  }
  func.func @transform_2(%arg0: i32, %arg1: i32) -> (i32, i32) {
    %c0_i32 = arith.constant 0 : i32
    %c0_i32_0 = arith.constant 0 : i32
    return %arg0, %c0_i32 : i32, i32
  }
}

</mosaic_0001>

<bundles_post_ra>
// kernel: arcface_loss.1
= control target key start
LH: loop header
LB: loop body
LE: loop exit
PB: predicated region body
PF: predicated region fallthrough
CT: control target
= control target key end

     0   :  { %vm15_vm0 = vcmask 7168   ;;  %v120_v0 = vmov 0   ;;  %v121_v2 = vmov -inf   ;;  %v22_v3 = vlaneseq  ;;  %s154_s1 = inlined_call_operand.vmem [shape: s32[8,1], index: 1, kind: input, shape index: {}]   ;;  %s155_s0 = inlined_call_operand.vmem [shape: f32[8,128], index: 0, kind: input, shape index: {}]   ;;  %s156_s2 = inlined_call_operand.vmem [shape: f32[8,1], index: 2, kind: output, shape index: {}]  }
   0x1   :  { %106 = vset.pattern.permute.xlu0 %v120_v0  ;;  %v20_v1 = vld [vmem:[%s154_s1] sm:$0xff]  ;;  %16 = vst.msk [vmem:[#allocation2] sm:$0xff] %vm15_vm0, %v121_v2  ;;  %107 = vset.pattern.permute.xlu1 %v120_v0  ;;  %v122_v9 = vmov 0.0  }
   0x2   :  { %27 = vperm.xlu0 %106, %v20_v1   ;;  %v19_v4 = vld [vmem:[%s155_s0] sm:$0xff]  ;;  %v23_v5 = vand.u32 127, %v22_v3  ;;  %18 = vst.msk [vmem:[#allocation4] sm:$0xff] %vm15_vm0, %v122_v9  ;;  %17 = vst.msk [vmem:[#allocation3] sm:$0xff] %vm15_vm0, %v122_v9 }
   0x3   :  { %v37_v6 = vmul.f32 30.0, %v19_v4 }
   0x8   :  { %v39_v10 = vld [vmem:[#allocation2] sm:$0xff] }
   0x9   :  { %v30_v19 = vld [vmem:[#allocation4] sm:$0xff]  ;;  %v43_v45 = vld [vmem:[#allocation3] sm:$0xff] }
  0x7d   :  { %v28_v7 = vpop.permute.xlu0 %27 }
  0x7e   :  { %vm29_vm1 = vcmp.eq.s32.totalorder %v23_v5, %v28_v7 }
  0x7f   :  { %v38_v8 = vsel %vm29_vm1, -1e+30, %v37_v6  ;;  %v31_v14 = vsel %vm29_vm1, %v19_v4, 0.0 }
  0x80   :  { %40 = vmax.xlane.f32.xlu0 %v38_v8 }
 0x109   :  { %v41_v11 = vpop.xlane.xlu0 %40 }
 0x10a   :  { %v42_v12 = vmax.f32 %v39_v10, %v41_v11 }
 0x10c   :  { %v44_v13 = vsub.f32 %v39_v10, %v42_v12  ;;  %60 = vst.msk [vmem:[#allocation2] sm:$0xff] %vm15_vm0, %v42_v12  ;;  %50 = vperm.xlu1 %107, %v42_v12  }
 0x10e   :  { %v45_v36 = vmul.f32 1.442695, %v44_v13 }
 0x113   :  { %v82_v38 = vld [vmem:[#allocation2] sm:$0xff] }
 0x130   :  { %32 = vadd.xlane.f32.xlu1 %v31_v14 }
 0x187   :  { %v51_v15 = vpop.permute.xlu1 %50 }
 0x188   :  { %v53_v16 = vsub.f32 %v38_v8, %v51_v15 }
 0x18a   :  { %v54_v17 = vmul.f32 1.442695, %v53_v16 }
 0x18c   :  { %108 = vpow2.f32 %v54_v17 }
 0x199   :  { %v109_v18 = vpop.eup %108 }
 0x19a   :  { %56 = vadd.xlane.f32.xlu0 %v109_v18 }
 0x1b9   :  { %v33_v20 = vpop.xlane.xlu1 %32 }
 0x1ba   :  { %v34_v21 = vadd.f32 %v33_v20, %v30_v19 }
 0x1bc   :  { %36 = vst.msk [vmem:[#allocation4] sm:$0xff] %vm15_vm0, %v34_v21 }
 0x1c3   :  { %v64_v22 = vld [vmem:[#allocation4] sm:$0xff] }
 0x1c4   :  { %v65_v23 = vmul.f32 %v64_v22, %v64_v22  ;;  %v75_v32 = vmul.f32 0.87758255, %v64_v22  ;;  %v102_v34 = vadd.f32 -0.23971277, %v64_v22  ;;  %vm78_vm4 = vcmp.gt.f32.partialorder %v64_v22, -0.87758255 }
 0x1c6   :  { %v66_v24 = vsub.f32 1.0, %v65_v23 }
 0x1c8   :  { %v67_v25 = vmax.f32 %v66_v24, 0.0 }
 0x1ca   :  { %110 = vrsqrt.f32 %v67_v25  ;;  %vm70_vm2 = vcmp.eq.f32.partialorder %v67_v25, inf  ;;  %v73_v29 = vand.u32 2147483648, %v67_v25  ;;  %vm72_vm3 = vcmp.eq.f32.partialorder %v67_v25, 0.0 }
 0x1cb   :  { %112 = vpow2.f32 %v45_v36 }
 0x1d7   :  { %v111_v26 = vpop.eup %110 }
 0x1d8   :  { %v69_v27 = vmul.f32 %v111_v26, %v67_v25  ;;  %v113_v44 = vpop.eup %112 }
 0x1d9   :  { %v47_v46 = vmul.f32 %v113_v44, %v43_v45 }
 0x1da   :  { %v71_v28 = vsel %vm70_vm2, %v67_v25, %v69_v27 }
 0x1db   :  { %v74_v30 = vsel %vm72_vm3, %v73_v29, %v71_v28 }
 0x1dc   :  { %v76_v31 = vmul.f32 0.47942555, %v74_v30 }
 0x1de   :  { %v77_v33 = vsub.f32 %v75_v32, %v76_v31 }
 0x1e0   :  { %v80_v35 = vsel %vm78_vm4, %v77_v33, %v102_v34 }
 0x1e1   :  { %v81_v37 = vmul.f32 30.0, %v80_v35 }
 0x1e3   :  { %v83_v39 = vmax.f32 %v82_v38, %v81_v37 }
 0x1e5   :  { %v85_v40 = vsub.f32 %v82_v38, %v83_v39  ;;  %v89_v41 = vsub.f32 %v81_v37, %v83_v39 }
 0x1e7   :  { %v86_v42 = vmul.f32 1.442695, %v85_v40  ;;  %v90_v43 = vmul.f32 1.442695, %v89_v41 }
 0x1e9   :  { %114 = vpow2.f32 %v86_v42 }
 0x1ea   :  { %116 = vpow2.f32 %v90_v43 }
 0x1f6   :  { %v115_v49 = vpop.eup %114 }
 0x1f7   :  { %v117_v52 = vpop.eup %116 }
 0x223   :  { %v57_v47 = vpop.xlane.xlu0 %56 }
 0x224   :  { %v58_v48 = vadd.f32 %v57_v47, %v47_v46 }
 0x226   :  { %59 = vst.msk [vmem:[#allocation3] sm:$0xff] %vm15_vm0, %v58_v48 }
 0x22d   :  { %v84_v50 = vld [vmem:[#allocation3] sm:$0xff] }
 0x22e   :  { %v88_v51 = vmul.f32 %v115_v49, %v84_v50 }
 0x230   :  { %v92_v53 = vadd.f32 %v117_v52, %v88_v51 }
 0x232   :  { %118 = vlog2.f32 %v92_v53 }
 0x23f   :  { %v119_v54 = vpop.eup %118 }
 0x240   :  { %v94_v55 = vmul.f32 0.6931472, %v119_v54 }
 0x242   :  { %v95_v56 = vadd.f32 %v94_v55, %v83_v39 }
 0x244   :  { %v96_v57 = vsub.f32 %v95_v56, %v81_v37 }
 0x246   :  { %97 = vst.msk [vmem:[%s156_s2] sm:$0xff] %vm15_vm0, %v96_v57 }

</bundles_post_ra>
